<compile_context>
chip_gen: v7x
topology: tpu7x:2x2x1
jax: 0.10.0
libtpu: 0.0.40
codegen_flags: <defaults>
</compile_context>

<pallas_src>
import functools

import jax
import jax.numpy as jnp
from jax.experimental import pallas as pl
from jax.experimental.pallas import tpu as pltpu

EPS = 1e-5


# ----------------------------------------------------------------------------
# Pass 1: conv-as-GEMM tile (lane-dense, per-sample) + per-sample sum / sumsq.
# Grid = (N, n_hw_tiles); accumulators are indexed by n (parallel-safe).
# ----------------------------------------------------------------------------
def _conv_stats_kernel(w_ref, p_ref, y_ref, sum_ref, sq_ref):
    @pl.when(pl.program_id(1) == 0)
    def _():
        sum_ref[...] = jnp.zeros_like(sum_ref)
        sq_ref[...] = jnp.zeros_like(sq_ref)

    # (c_out, K) @ (K, TM) -> (c_out, TM); bf16 operands, f32 accumulation (MXU).
    y = jnp.dot(w_ref[...], p_ref[0], preferred_element_type=jnp.float32)

    # Store y in bf16 (inter-pass HBM traffic halved); stats stay f32.
    y_ref[...] = y[None].astype(y_ref.dtype)

    # Cross-lane reductions accumulated into the VMEM-resident (1, c_out, 1) blocks.
    sum_ref[...] += jnp.sum(y, axis=1, keepdims=True)[None]
    sq_ref[...] += jnp.sum(y * y, axis=1, keepdims=True)[None]


# ----------------------------------------------------------------------------
# Pass 2: folded BatchNorm affine (scale/shift) + optional ReLU, per tile.
# Output is written directly in (N, c_out, Ho*Wo) layout -> no wrapper transpose.
# ----------------------------------------------------------------------------
def _bn_relu_kernel(scale_ref, shift_ref, y_ref, o_ref, *, apply_relu):
    y = y_ref[0].astype(jnp.float32)                      # (c_out, TM)
    out = y * scale_ref[...] + shift_ref[...]             # broadcast (c_out,1)
    if apply_relu:
        out = jnp.maximum(out, 0.0)
    o_ref[...] = out[None].astype(o_ref.dtype)


# ----------------------------------------------------------------------------
# Wrapper: bf16 im2col (per-sample layout) + two pallas_calls.
# ----------------------------------------------------------------------------
def block_forward(x_nchw, weight, bias, gamma, beta, *, fs, p=0, rl=True,
                  tm=1024, out_dtype=jnp.float32):
    """Equivalent of Block.forward.

    x_nchw : (N, c_in, H, W)
    weight : (c_out, c_in, fs, fs)   (PyTorch conv layout)
    bias, gamma, beta : (c_out,)
    """
    N, c_in, H, W = x_nchw.shape
    c_out = weight.shape[0]
    Ho = H + 2 * p - fs + 1
    Wo = W + 2 * p - fs + 1
    HWo = Ho * Wo
    K = fs * fs * c_in
    M = N * HWo                                   # true element count for BN stats

    # Conv bias cancels exactly under training-mode BatchNorm (mean contains it).
    del bias

    # Per-sample spatial tile: multiple of 128, clamped to the (rounded) image size.
    tm_hw = min(tm, pl.cdiv(HWo, 128) * 128)
    n_hw_tiles = pl.cdiv(HWo, tm_hw)
    hw_pad = n_hw_tiles * tm_hw

    # --- im2col built DIRECTLY in bf16, per-sample layout (N, K, Ho*Wo).
    # K index = (dy*fs + dx)*c_in + c, matching the weight reshape below.
    xp = jnp.pad(x_nchw.astype(jnp.bfloat16), ((0, 0), (0, 0), (p, p), (p, p)))
    cols = []
    for dy in range(fs):
        for dx in range(fs):
            cols.append(xp[:, :, dy:dy + Ho, dx:dx + Wo].reshape(N, c_in, HWo))
    patches = jnp.concatenate(cols, axis=1)                       # (N, K, HWo) bf16
    if hw_pad != HWo:
        # Zero columns: contribute y == 0 (no bias), hence 0 to sum / sumsq.
        patches = jnp.pad(patches, ((0, 0), (0, 0), (0, hw_pad - HWo)))

    # (c_out, c_in, fs, fs) -> (c_out, fs, fs, c_in) -> (c_out, K)
    w_mat = jnp.transpose(weight, (0, 2, 3, 1)).reshape(c_out, K).astype(jnp.bfloat16)

    cost1 = pl.CostEstimate(
        flops=2 * N * hw_pad * K * c_out,
        transcendentals=0,
        bytes_accessed=(patches.size * 2 + w_mat.size * 2
                        + N * c_out * hw_pad * 2 + 2 * N * c_out * 4))

    y_bf16, sums, sqs = pl.pallas_call(
        _conv_stats_kernel,
        grid=(N, n_hw_tiles),
        in_specs=[
            pl.BlockSpec((c_out, K), lambda n, j: (0, 0)),        # W: VMEM-resident
            pl.BlockSpec((1, K, tm_hw), lambda n, j: (n, 0, j)),  # patches tile
        ],
        out_specs=(
            pl.BlockSpec((1, c_out, tm_hw), lambda n, j: (n, 0, j)),  # y (bf16, lane-dense)
            pl.BlockSpec((1, c_out, 1), lambda n, j: (n, 0, 0)),      # per-sample sum
            pl.BlockSpec((1, c_out, 1), lambda n, j: (n, 0, 0)),      # per-sample sumsq
        ),
        out_shape=(
            jax.ShapeDtypeStruct((N, c_out, hw_pad), jnp.bfloat16),
            jax.ShapeDtypeStruct((N, c_out, 1), jnp.float32),
            jax.ShapeDtypeStruct((N, c_out, 1), jnp.float32),
        ),
        compiler_params=pltpu.CompilerParams(
            dimension_semantics=("parallel", "arbitrary"),  # N shardable, spatial = reduction
            vmem_limit_bytes=32 * 1024 * 1024),
        cost_estimate=cost1,
    )(w_mat, patches)

    # --- Combine per-sample partial stats (tiny), fold BN into per-channel scale/shift.
    sum_c = jnp.sum(sums, axis=0)                           # (c_out, 1)
    sq_c = jnp.sum(sqs, axis=0)                             # (c_out, 1)
    inv_m = 1.0 / float(M)                                  # true M (padding contributes 0)
    mean = sum_c * inv_m
    var = jnp.maximum(sq_c * inv_m - mean * mean, 0.0)      # clamp: avoid cancellation NaNs
    rstd = jax.lax.rsqrt(var + EPS)
    scale = gamma.reshape(c_out, 1).astype(jnp.float32) * rstd
    shift = beta.reshape(c_out, 1).astype(jnp.float32) - mean * scale

    cost2 = pl.CostEstimate(
        flops=2 * N * c_out * hw_pad,
        transcendentals=0,
        bytes_accessed=(N * c_out * hw_pad * (2 + jnp.dtype(out_dtype).itemsize)
                        + 4 * c_out * 4))

    out = pl.pallas_call(
        functools.partial(_bn_relu_kernel, apply_relu=rl),
        grid=(N, n_hw_tiles),
        in_specs=[
            pl.BlockSpec((c_out, 1), lambda n, j: (0, 0)),
            pl.BlockSpec((c_out, 1), lambda n, j: (0, 0)),
            pl.BlockSpec((1, c_out, tm_hw), lambda n, j: (n, 0, j)),
        ],
        out_specs=pl.BlockSpec((1, c_out, tm_hw), lambda n, j: (n, 0, j)),
        out_shape=jax.ShapeDtypeStruct((N, c_out, hw_pad), out_dtype),
        compiler_params=pltpu.CompilerParams(
            dimension_semantics=("parallel", "parallel"),   # fully megacore-shardable
            vmem_limit_bytes=32 * 1024 * 1024),
        cost_estimate=cost2,
    )(scale, shift, y_bf16)

    # Output is already NCHW-ordered: only split the minor spatial dim (free reshape).
    if hw_pad != HWo:
        out = out[:, :, :HWo]
    return out.reshape(N, c_out, Ho, Wo)


# ----------------------------------------------------------------------------
# Pure-JAX reference (bf16 conv inputs / f32 accumulate, as in the kernel; the
# kernel additionally stores the conv output in bf16 between passes, which the
# test tolerance below covers).
# ----------------------------------------------------------------------------
def _reference(x_nchw, weight, bias, gamma, beta, *, fs, p, rl):
    xb = x_nchw.astype(jnp.bfloat16).astype(jnp.float32)
    wb = weight.astype(jnp.bfloat16).astype(jnp.float32)
    y = jax.lax.conv_general_dilated(
        xb, wb, window_strides=(1, 1), padding=[(p, p), (p, p)],
        dimension_numbers=("NCHW", "OIHW", "NCHW"))
    y = y + bias.reshape(1, -1, 1, 1)          # bias kept here; training-mode BN cancels it
    mean = jnp.mean(y, axis=(0, 2, 3), keepdims=True)
    var = jnp.maximum(jnp.mean(y * y, axis=(0, 2, 3), keepdims=True) - mean * mean, 0.0)
    y = (y - mean) * jax.lax.rsqrt(var + EPS)
    y = y * gamma.reshape(1, -1, 1, 1) + beta.reshape(1, -1, 1, 1)
    return jnp.maximum(y, 0.0) if rl else y


if __name__ == "__main__":
    # Block(c_in=4, c_out=8, fs=3, p=1, rl=True) on x: (2, 4, 16, 16)
    N, c_in, H, W = 2, 4, 16, 16
    c_out, fs, p, rl = 8, 3, 1, True

    key = jax.random.PRNGKey(0)
    kx, kw, kb, kg, kbe = jax.random.split(key, 5)
    x = jax.random.normal(kx, (N, c_in, H, W), dtype=jnp.float32)
    weight = jax.random.normal(kw, (c_out, c_in, fs, fs), dtype=jnp.float32) * 0.1
    bias = jax.random.normal(kb, (c_out,), dtype=jnp.float32) * 0.1
    gamma = 1.0 + 0.1 * jax.random.normal(kg, (c_out,), dtype=jnp.float32)
    beta = 0.1 * jax.random.normal(kbe, (c_out,), dtype=jnp.float32)

    fwd = jax.jit(functools.partial(block_forward, fs=fs, p=p, rl=rl))
    out = jax.block_until_ready(fwd(x, weight, bias, gamma, beta))

    ref = _reference(x, weight, bias, gamma, beta, fs=fs, p=p, rl=rl)
    assert out.shape == (N, c_out, H, W), out.shape
    max_err = float(jnp.max(jnp.abs(out - ref)))
    # Tolerance covers the bf16 storage of the conv output between the two passes
    # (worst case ~ gamma * |y|/sigma * 2^-8 ≈ 0.018 on normalized O(1) outputs).
    assert jnp.allclose(out, ref, rtol=1e-2, atol=2e-2), max_err

    print("KERNEL_OK")
</pallas_src>

<mosaic_0001>
module attributes {stable_mosaic.version = 11 : i64} {
  func.func @_conv_stats_kernel(%arg0: i32, %arg1: i32, %arg2: memref<8x36xbf16, #tpu.memory_space<vmem>>, %arg3: memref<1x36x256xbf16, #tpu.memory_space<vmem>>, %arg4: memref<1x8x256xbf16, #tpu.memory_space<vmem>>, %arg5: memref<1x8x1xf32, #tpu.memory_space<vmem>>, %arg6: memref<1x8x1xf32, #tpu.memory_space<vmem>>) attributes {dimension_semantics = [#tpu.dimension_semantics<parallel>, #tpu.dimension_semantics<arbitrary>], iteration_bounds = array<i64: 2, 1>, scalar_prefetch = 0 : i64, scratch_operands = 0 : i64, tpu.core_type = #tpu.core_type<tc>, window_params = [{pipeline_mode = #tpu.pipeline_mode<synchronous>, transform_indices = @transform_0, window_bounds = array<i64: 8, 36>}, {transform_indices = @transform_1, window_bounds = array<i64: 1, 36, 256>}, {transform_indices = @transform_2, window_bounds = array<i64: 1, 8, 256>}, {transform_indices = @transform_3, window_bounds = array<i64: 1, 8, 1>}, {transform_indices = @transform_4, window_bounds = array<i64: 1, 8, 1>}]} {
    %c0_i32 = arith.constant 0 : i32
    %0 = arith.cmpi eq, %arg1, %c0_i32 : i32
    %1 = arith.extui %0 : i1 to i32
    %c0_i32_0 = arith.constant 0 : i32
    %2 = arith.cmpi ne, %1, %c0_i32_0 : i32
    scf.if %2 {
      %cst_22 = arith.constant 0.000000e+00 : f32
      %23 = vector.broadcast %cst_22 : f32 to vector<1x8x1xf32>
      %c0_23 = arith.constant 0 : index
      %c0_24 = arith.constant 0 : index
      %c0_25 = arith.constant 0 : index
      %24 = vector.load %arg5[%c0_23, %c0_24, %c0_25] : memref<1x8x1xf32, #tpu.memory_space<vmem>>, vector<1x8x1xf32>
      tpu.vector_store %arg5[%c0_23, %c0_24, %c0_25], %23 {strides = array<i32>} : memref<1x8x1xf32, #tpu.memory_space<vmem>>, vector<1x8x1xf32>,
      %cst_26 = arith.constant 0.000000e+00 : f32
      %25 = vector.broadcast %cst_26 : f32 to vector<1x8x1xf32>
      %c0_27 = arith.constant 0 : index
      %c0_28 = arith.constant 0 : index
      %c0_29 = arith.constant 0 : index
      %26 = vector.load %arg6[%c0_27, %c0_28, %c0_29] : memref<1x8x1xf32, #tpu.memory_space<vmem>>, vector<1x8x1xf32>
      tpu.vector_store %arg6[%c0_27, %c0_28, %c0_29], %25 {strides = array<i32>} : memref<1x8x1xf32, #tpu.memory_space<vmem>>, vector<1x8x1xf32>,
    } else {
    }
    %c0 = arith.constant 0 : index
    %c0_1 = arith.constant 0 : index
    %3 = vector.load %arg2[%c0, %c0_1] : memref<8x36xbf16, #tpu.memory_space<vmem>>, vector<8x36xbf16>
    %c0_2 = arith.constant 0 : index
    %c0_3 = arith.constant 0 : index
    %c0_4 = arith.constant 0 : index
    %4 = vector.load %arg3[%c0_2, %c0_3, %c0_4] : memref<1x36x256xbf16, #tpu.memory_space<vmem>>, vector<1x36x256xbf16>
    %5 = vector.shape_cast %4 : vector<1x36x256xbf16> to vector<36x256xbf16>
    %cst = arith.constant dense<0.000000e+00> : vector<8x256xf32>
    %6 = tpu.matmul %3, %5, %cst {dimension_numbers = #tpu.dot_dimension_numbers<[1], [0], [0], [1], [0, 0, 1, 1], [], []>} : vector<8x36xbf16>, vector<36x256xbf16>, vector<8x256xf32> -> vector<8x256xf32>
    %7 = vector.shape_cast %6 : vector<8x256xf32> to vector<1x8x256xf32>
    %8 = arith.truncf %7 : vector<1x8x256xf32> to vector<1x8x256xbf16>
    %c0_5 = arith.constant 0 : index
    %c0_6 = arith.constant 0 : index
    %c0_7 = arith.constant 0 : index
    %9 = vector.load %arg4[%c0_5, %c0_6, %c0_7] : memref<1x8x256xbf16, #tpu.memory_space<vmem>>, vector<1x8x256xbf16>
    tpu.vector_store %arg4[%c0_5, %c0_6, %c0_7], %8 {strides = array<i32>} : memref<1x8x256xbf16, #tpu.memory_space<vmem>>, vector<1x8x256xbf16>,
    %c0_8 = arith.constant 0 : index
    %c0_9 = arith.constant 0 : index
    %c0_10 = arith.constant 0 : index
    %10 = vector.load %arg5[%c0_8, %c0_9, %c0_10] : memref<1x8x1xf32, #tpu.memory_space<vmem>>, vector<1x8x1xf32>
    %cst_11 = arith.constant dense<0.000000e+00> : vector<8xf32>
    %11 = vector.multi_reduction <add>, %6, %cst_11 [1] : vector<8x256xf32> to vector<8xf32>
    %12 = vector.shape_cast %11 : vector<8xf32> to vector<8x1xf32>
    %13 = vector.shape_cast %12 : vector<8x1xf32> to vector<1x8x1xf32>
    %14 = arith.addf %10, %13 : vector<1x8x1xf32>
    %c0_12 = arith.constant 0 : index
    %c0_13 = arith.constant 0 : index
    %c0_14 = arith.constant 0 : index
    %15 = vector.load %arg5[%c0_12, %c0_13, %c0_14] : memref<1x8x1xf32, #tpu.memory_space<vmem>>, vector<1x8x1xf32>
    tpu.vector_store %arg5[%c0_12, %c0_13, %c0_14], %14 {strides = array<i32>} : memref<1x8x1xf32, #tpu.memory_space<vmem>>, vector<1x8x1xf32>,
    %c0_15 = arith.constant 0 : index
    %c0_16 = arith.constant 0 : index
    %c0_17 = arith.constant 0 : index
    %16 = vector.load %arg6[%c0_15, %c0_16, %c0_17] : memref<1x8x1xf32, #tpu.memory_space<vmem>>, vector<1x8x1xf32>
    %17 = arith.mulf %6, %6 : vector<8x256xf32>
    %cst_18 = arith.constant dense<0.000000e+00> : vector<8xf32>
    %18 = vector.multi_reduction <add>, %17, %cst_18 [1] : vector<8x256xf32> to vector<8xf32>
    %19 = vector.shape_cast %18 : vector<8xf32> to vector<8x1xf32>
    %20 = vector.shape_cast %19 : vector<8x1xf32> to vector<1x8x1xf32>
    %21 = arith.addf %16, %20 : vector<1x8x1xf32>
    %c0_19 = arith.constant 0 : index
    %c0_20 = arith.constant 0 : index
    %c0_21 = arith.constant 0 : index
    %22 = vector.load %arg6[%c0_19, %c0_20, %c0_21] : memref<1x8x1xf32, #tpu.memory_space<vmem>>, vector<1x8x1xf32>
    tpu.vector_store %arg6[%c0_19, %c0_20, %c0_21], %21 {strides = array<i32>} : memref<1x8x1xf32, #tpu.memory_space<vmem>>, vector<1x8x1xf32>,
    return
  }
  func.func @transform_0(%arg0: i32, %arg1: i32) -> (i32, i32) {
    %c0_i32 = arith.constant 0 : i32
    %c0_i32_0 = arith.constant 0 : i32
    %c0_i32_1 = arith.constant 0 : i32
    return %c0_i32, %c0_i32_0 : i32, i32
  }
  func.func @transform_1(%arg0: i32, %arg1: i32) -> (i32, i32, i32) {
    %c0_i32 = arith.constant 0 : i32
    %c0_i32_0 = arith.constant 0 : i32
    return %arg0, %c0_i32, %arg1 : i32, i32, i32
  }
  func.func @transform_2(%arg0: i32, %arg1: i32) -> (i32, i32, i32) {
    %c0_i32 = arith.constant 0 : i32
    %c0_i32_0 = arith.constant 0 : i32
    return %arg0, %c0_i32, %arg1 : i32, i32, i32
  }
  func.func @transform_3(%arg0: i32, %arg1: i32) -> (i32, i32, i32) {
    %c0_i32 = arith.constant 0 : i32
    %c0_i32_0 = arith.constant 0 : i32
    %c0_i32_1 = arith.constant 0 : i32
    return %arg0, %c0_i32, %c0_i32_0 : i32, i32, i32
  }
  func.func @transform_4(%arg0: i32, %arg1: i32) -> (i32, i32, i32) {
    %c0_i32 = arith.constant 0 : i32
    %c0_i32_0 = arith.constant 0 : i32
    %c0_i32_1 = arith.constant 0 : i32
    return %arg0, %c0_i32, %c0_i32_0 : i32, i32, i32
  }
}

module attributes {stable_mosaic.version = 11 : i64} {
  func.func @_bn_relu_kernel(%arg0: i32, %arg1: i32, %arg2: memref<8x1xf32, #tpu.memory_space<vmem>>, %arg3: memref<8x1xf32, #tpu.memory_space<vmem>>, %arg4: memref<1x8x256xbf16, #tpu.memory_space<vmem>>, %arg5: memref<1x8x256xf32, #tpu.memory_space<vmem>>) attributes {dimension_semantics = [#tpu.dimension_semantics<parallel>, #tpu.dimension_semantics<parallel>], iteration_bounds = array<i64: 2, 1>, scalar_prefetch = 0 : i64, scratch_operands = 0 : i64, tpu.core_type = #tpu.core_type<tc>, window_params = [{pipeline_mode = #tpu.pipeline_mode<synchronous>, transform_indices = @transform_0, window_bounds = array<i64: 8, 1>}, {pipeline_mode = #tpu.pipeline_mode<synchronous>, transform_indices = @transform_1, window_bounds = array<i64: 8, 1>}, {transform_indices = @transform_2, window_bounds = array<i64: 1, 8, 256>}, {transform_indices = @transform_3, window_bounds = array<i64: 1, 8, 256>}]} {
    %c0 = arith.constant 0 : index
    %c0_0 = arith.constant 0 : index
    %c0_1 = arith.constant 0 : index
    %0 = vector.load %arg4[%c0, %c0_0, %c0_1] : memref<1x8x256xbf16, #tpu.memory_space<vmem>>, vector<1x8x256xbf16>
    %1 = vector.shape_cast %0 : vector<1x8x256xbf16> to vector<8x256xbf16>
    %2 = arith.extf %1 : vector<8x256xbf16> to vector<8x256xf32>
    %c0_2 = arith.constant 0 : index
    %c0_3 = arith.constant 0 : index
    %3 = vector.load %arg2[%c0_2, %c0_3] : memref<8x1xf32, #tpu.memory_space<vmem>>, vector<8x1xf32>
    %4 = vector.broadcast %3 : vector<8x1xf32> to vector<8x256xf32>
    %5 = arith.mulf %2, %4 : vector<8x256xf32>
    %c0_4 = arith.constant 0 : index
    %c0_5 = arith.constant 0 : index
    %6 = vector.load %arg3[%c0_4, %c0_5] : memref<8x1xf32, #tpu.memory_space<vmem>>, vector<8x1xf32>
    %7 = vector.broadcast %6 : vector<8x1xf32> to vector<8x256xf32>
    %8 = arith.addf %5, %7 : vector<8x256xf32>
    %cst = arith.constant 0.000000e+00 : f32
    %9 = vector.broadcast %cst : f32 to vector<8x256xf32>
    %10 = arith.maximumf %8, %9 : vector<8x256xf32>
    %11 = vector.shape_cast %10 : vector<8x256xf32> to vector<1x8x256xf32>
    %c0_6 = arith.constant 0 : index
    %c0_7 = arith.constant 0 : index
    %c0_8 = arith.constant 0 : index
    %12 = vector.load %arg5[%c0_6, %c0_7, %c0_8] : memref<1x8x256xf32, #tpu.memory_space<vmem>>, vector<1x8x256xf32>
    tpu.vector_store %arg5[%c0_6, %c0_7, %c0_8], %11 {strides = array<i32>} : memref<1x8x256xf32, #tpu.memory_space<vmem>>, vector<1x8x256xf32>,
    return
  }
  func.func @transform_0(%arg0: i32, %arg1: i32) -> (i32, i32) {
    %c0_i32 = arith.constant 0 : i32
    %c0_i32_0 = arith.constant 0 : i32
    %c0_i32_1 = arith.constant 0 : i32
    return %c0_i32, %c0_i32_0 : i32, i32
  }
  func.func @transform_1(%arg0: i32, %arg1: i32) -> (i32, i32) {
    %c0_i32 = arith.constant 0 : i32
    %c0_i32_0 = arith.constant 0 : i32
    %c0_i32_1 = arith.constant 0 : i32
    return %c0_i32, %c0_i32_0 : i32, i32
  }
  func.func @transform_2(%arg0: i32, %arg1: i32) -> (i32, i32, i32) {
    %c0_i32 = arith.constant 0 : i32
    %c0_i32_0 = arith.constant 0 : i32
    return %arg0, %c0_i32, %arg1 : i32, i32, i32
  }
  func.func @transform_3(%arg0: i32, %arg1: i32) -> (i32, i32, i32) {
    %c0_i32 = arith.constant 0 : i32
    %c0_i32_0 = arith.constant 0 : i32
    return %arg0, %c0_i32, %arg1 : i32, i32, i32
  }
}

</mosaic_0001>

<bundles_post_ra>
// kernel: block_forward.2
= control target key start
LH: loop header
LB: loop body
LE: loop exit
PB: predicated region body
PF: predicated region fallthrough
CT: control target
= control target key end

     0   :  { %s631_s15 = smov 0   ;;  %s633_s16 = smov 0   ;;  %s677_s0 = inlined_call_operand.vmem [shape: bf16[8,36], index: 0, kind: input, shape index: {}]   ;;  %s678_s1 = inlined_call_operand.vmem [shape: bf16[2,36,256], index: 1, kind: input, shape index: {}]   ;;  %s679_s2 = inlined_call_operand.vmem [shape: bf16[2,8,256], index: 2, kind: output, shape index: {0}]   ;;  %s680_s3 = inlined_call_operand.vmem [shape: f32[2,8,1], index: 3, kind: output, shape index: {1}]   ;;  %s681_s4 = inlined_call_operand.vmem [shape: f32[2,8,1], index: 4, kind: output, shape index: {2}]  }
   0x1   :  { %s635_s17 = smov 0  }
   0x2 LB: > { %s27_s18 = sadd.s32 1, %s598_s16  ;;  %p526_p0 = scmp.ge.s32.totalorder %s602_s17, 1  ;;  %s602_s17 = sphi %s635_s17, %s15_s17   ;;  %s598_s16 = sphi %s633_s16, %s683_s16   ;;  %s594_s15 = sphi %s631_s15, %s682_s15  }
   0x3   : > { %p29_p1 = scmp.ge.s32.totalorder %s27_s18, 2  ;;  %p188_p2 = scmp.lt.s32.totalorder %s602_s17, 3 }
   0x5   : > { %s685_s18 = smov (%p29_p1, %s27_s18), 0  ;;  %p189_p3 = pnand %p526_p0, %p188_p2 }
   0x6   : > { %p231_p4 = scmp.lt.s32.totalorder (!%p189_p3), %s594_s15, 1  ;;  %v604_v0 = vmov (!%p189_p3), 0   ;;  %vm301_vm0 = vcmask (!%p189_p3), 1041408   ;;  %v266_v9 = vld [vmem:[%s677_s0] sm:$0xf] (!%p189_p3)  ;;  %vm297_vm1 = vcmask (!%p189_p3), 293888  }
   0x7   : > { %192 = sbr.rel (%p189_p3) target bundleno = 395 (0x18b), region = 28  ;;  %340 = vmatprep.mubr.bf16.mxu0 (!%p189_p3), %v604_v0  ;;  %vm263_vm2 = vcmask (!%p189_p3), 7168   ;;  %v605_v10 = vmov (!%p189_p3), 0.0  }
   0xe   : > { %s687_s15 = smov (!%p231_p4, %s594_s15), 1 }
   0xf   : > { %s545_s19 = smul.u32 40, %s687_s15  ;;  %s543_s25 = sshll.u32 %s687_s15, 3 }
  0x10   : > { %s253_s28 = scalar_lea.vmem %s680_s3, %s543_s25  ;;  %s248_s5 = scalar_lea.vmem %s679_s2, %s543_s25 }
  0x11   : > { %s238_s22 = scalar_lea.vmem %s678_s1, %s545_s19  ;;  %264 = vst.msk [vmem:[%s253_s28] sm:$0xff] %vm263_vm2, %v605_v10  ;;  %s257_s8 = scalar_lea.vmem %s681_s4, %s543_s25 }
  0x12   : > { %v572_v1 = vld [vmem:[%s238_s22 + $0x4] ss:$8 sps:$4 sm:$0xff]   ;;  %v574_v2 = vld [vmem:[%s238_s22] ss:$8 sps:$4 sm:$0xff]   ;;  %v575_v3 = vld [vmem:[%s238_s22 + $0x14] ss:$8 sps:$4 sm:$0xff]  }
  0x13   : > { %308 = vmatprep.subr.bf16.mxu0 %v572_v1  ;;  %v271_v4 = vld [vmem:[%s238_s22 + $0x20] sm:$0x33]  ;;  %v577_v5 = vld [vmem:[%s238_s22 + $0x10] ss:$8 sps:$4 sm:$0xff]   ;;  %265 = vst.msk [vmem:[%s257_s8] sm:$0xff] %vm263_vm2, %v605_v10 }
  0x14   : > { %309 = vmatpush1.bf16.msra.mxu0 %v574_v2  ;;  %v537_v6 = vcombine.high %v271_v4, %v271_v4  ;;  %v536_v7 = vcombine.low %v271_v4, %v271_v4 }
  0x15   : > { %310 = vmatprep.subr.bf16.mxu0 %v575_v3 }
  0x16   : > { %v303_v8 = vsel %vm301_vm0, %v536_v7, 0 }
  0x18   : > { %311 = vmatpush1.bf16.msra.mxu0 %v577_v5  ;;  %v358_v20 = vld [vmem:[%s253_s28] sm:$0xff] }
  0x19   : > { %538 = vmatprep.subr.msk.bf16.mxu0 %vm301_vm0, %v537_v6 }
  0x1a   : > { %v365_v23 = vld [vmem:[%s257_s8] sm:$0xff] }
  0x1c   : > { %313 = vmatpush1.bf16.msra.mxu0 %v303_v8 }
  0x1f   : > { %539 = vmatmul.mubr.msk.bf16.vlgmr.msra.gmra.mrb[0].mxu0 %vm297_vm1, %v266_v9 }
  0xf2   : > { %v342_v11 = vpop.f32.mrb[0].mxu0 }
  0xf3   : > { %v344_v12 = vpop.f32.mrb[1].mxu0  ;;  %v366_v13 = vmul.f32 %v342_v11, %v342_v11 }
  0xf4   : > { %v544_v14 = vpack.c.bf16 %v344_v12, %v342_v11  ;;  %v346_v15 = vpop.f32.mrb[2].mxu0  ;;  %v359_v16 = vadd.f32 %v344_v12, %v342_v11  ;;  %v367_v17 = vmul.f32 %v344_v12, %v344_v12 }
  0xf5   : > { %v347_v18 = vpop.f32.mrb[3].mxu0 }
  0xf6   : > { %357 = vst [vmem:[%s248_s5] sm:$0xff] %v544_v14  ;;  %360 = vadd.xlane.f32.xlu0 %v359_v16  ;;  %v368_v19 = vadd.f32 %v367_v17, %v366_v13 }
  0xfa   : > { %369 = vadd.xlane.f32.xlu0 %v368_v19 }
 0x183   : > { %v361_v21 = vpop.xlane.xlu0 %360 }
 0x184   : > { %v362_v22 = vadd.f32 %v361_v21, %v358_v20 }
 0x186   : > { %364 = vst.msk [vmem:[%s253_s28] sm:$0xff] %vm263_vm2, %v362_v22 }
 0x187   : > { %v370_v24 = vpop.xlane.xlu0 %369 }
 0x188   : > { %v371_v25 = vadd.f32 %v370_v24, %v365_v23 }
 0x18a   : > { %372 = vst.msk [vmem:[%s257_s8] sm:$0xff] %vm263_vm2, %v371_v25 }
 0x18b PF: > { %s15_s17 = sadd.s32 1, %s602_s17   ;;  %s682_s15 = smov %s598_s16 }
 0x18c   : > { %p12_p5 = scmp.ge.s32.totalorder %s15_s17, 4   ;;  %s683_s16 = smov %s685_s18 }
 0x18e   :  { %14 = sbr.rel (!%p12_p5) target bundleno = 2 (0x2), region = 86 }

// kernel: block_forward.3
= control target key start
LH: loop header
LB: loop body
LE: loop exit
PB: predicated region body
PF: predicated region fallthrough
CT: control target
= control target key end

     0   :  { %s404_s12 = smov 0   ;;  %s406_s13 = smov 0   ;;  %s443_s0 = inlined_call_operand.vmem [shape: f32[8,1], index: 0, kind: input, shape index: {}]   ;;  %s444_s1 = inlined_call_operand.vmem [shape: f32[8,1], index: 1, kind: input, shape index: {}]   ;;  %s445_s2 = inlined_call_operand.vmem [shape: bf16[2,8,256], index: 2, kind: input, shape index: {}]   ;;  %s446_s3 = inlined_call_operand.vmem [shape: f32[2,8,256], index: 3, kind: output, shape index: {}]  }
   0x1   :  { %s408_s14 = smov 0  }
   0x2 LB: > { %s25_s15 = sadd.s32 1, %s377_s13  ;;  %p324_p0 = scmp.ge.s32.totalorder %s381_s14, 1  ;;  %s381_s14 = sphi %s408_s14, %s13_s14   ;;  %s377_s13 = sphi %s406_s13, %s448_s13   ;;  %s373_s12 = sphi %s404_s12, %s447_s12  }
   0x3   : > { %p27_p1 = scmp.ge.s32.totalorder %s25_s15, 2  ;;  %p158_p2 = scmp.lt.s32.totalorder %s381_s14, 3 }
   0x5   : > { %s450_s15 = smov (%p27_p1, %s25_s15), 0  ;;  %p159_p3 = pnand %p324_p0, %p158_p2 }
   0x6   : > { %v213_v0 = vld [vmem:[%s443_s0] sm:$0xff] (!%p159_p3)  ;;  %v383_v1 = vmov (!%p159_p3), 0   ;;  %p191_p4 = scmp.lt.s32.totalorder (!%p159_p3), %s373_s12, 1 }
   0x7   : > { %162 = sbr.rel (%p159_p3) target bundleno = 145 (0x91), region = 32  ;;  %358 = vset.pattern.permute.xlu0 (!%p159_p3), %v383_v1  ;;  %v221_v2 = vld [vmem:[%s444_s1] sm:$0xff] (!%p159_p3) }
   0x8   : > { %216 = vperm.xlu0 (!%p159_p3), %358, %v213_v0  }
   0xc   : > { %224 = vperm.xlu0 (!%p159_p3), %358, %v221_v2  }
   0xe   : > { %s452_s12 = smov (!%p191_p4, %s373_s12), 1 }
   0xf   : > { %s331_s20 = sshll.u32 %s452_s12, 3  ;;  %s332_s24 = sshll.u32 %s452_s12, 4 }
  0x10   : > { %s198_s23 = scalar_lea.vmem %s445_s2, %s331_s20  ;;  %s208_s27 = scalar_lea.vmem %s446_s3, %s332_s24 }
  0x11   : > { %v210_v3 = vld [vmem:[%s198_s23] sm:$0xff] }
  0x12   : > { %v211_v4 = vunpack.c.l.bf16 %v210_v3  ;;  %v212_v5 = vunpack.c.h.bf16 %v210_v3 }
  0x87   : > { %v217_v6 = vpop.permute.xlu0 %216 }
  0x88   : > { %v219_v7 = vmul.f32 %v217_v6, %v211_v4  ;;  %v220_v8 = vmul.f32 %v217_v6, %v212_v5 }
  0x8b   : > { %v225_v9 = vpop.permute.xlu0 %224 }
  0x8c   : > { %v227_v10 = vadd.f32 %v225_v9, %v219_v7  ;;  %v228_v11 = vadd.f32 %v225_v9, %v220_v8 }
  0x8e   : > { %v229_v12 = vmax.f32 %v227_v10, 0.0  ;;  %v230_v13 = vmax.f32 %v228_v11, 0.0 }
  0x90   : > { %231 = vst [vmem:[%s208_s27] sm:$0xff] %v229_v12  ;;  %232 = vst [vmem:[%s208_s27 + $0x8] sm:$0xff] %v230_v13 }
  0x91 PF: > { %s13_s14 = sadd.s32 1, %s381_s14   ;;  %s447_s12 = smov %s377_s13 }
  0x92   : > { %p10_p5 = scmp.ge.s32.totalorder %s13_s14, 4   ;;  %s448_s13 = smov %s450_s15 }
  0x94   :  { %12 = sbr.rel (!%p10_p5) target bundleno = 2 (0x2), region = 62 }

</bundles_post_ra>
